<compile_context>
chip_gen: v6e
topology: v6e:2x2x1
jax: 0.10.0
libtpu: 0.0.40
codegen_flags: <defaults>
</compile_context>

<pallas_src>
import jax
import jax.numpy as jnp
from jax.experimental import pallas as pl
from jax.experimental.pallas import tpu as pltpu

_VMEM_LIMIT = 48 * 1024 * 1024        # safe on v5e/v6e (128 MiB) and under v7x's 64 MiB
_TILE_VMEM_BUDGET = 16 * 1024 * 1024  # target double-buffered per-tile footprint


def _round_up(v, m):
    return (v + m - 1) // m * m


def _pick_tile_m(M, K, C_out, mm_bytes, out_bytes, stash, tile_m):
    """Largest row-tile that keeps the double-buffered VMEM footprint under budget."""
    kp = _round_up(K, 128)            # lane-padded VMEM layout widths
    cp = _round_up(C_out, 128)
    per_row = 2 * (kp * mm_bytes + cp * out_bytes + (cp * 4 if stash else 0))
    tm = _TILE_VMEM_BUDGET // per_row
    tm = min(tm, tile_m, _round_up(M, 8))
    tm = max(8, (tm // 8) * 8)
    return int(tm)


# ---------- Pass 1: conv tile (im2col matmul) -> per-channel sum / sum-of-squares ------
def _stats_kernel(p_ref, w_ref, sum_ref, sq_ref):
    @pl.when(pl.program_id(1) == 0)
    def _():
        sum_ref[...] = jnp.zeros_like(sum_ref)
        sq_ref[...] = jnp.zeros_like(sq_ref)

    y = jnp.dot(p_ref[...], w_ref[...], preferred_element_type=jnp.float32)  # (TM, C) f32
    sum_ref[...] += jnp.sum(y, axis=0, keepdims=True)[None]
    sq_ref[...] += jnp.sum(y * y, axis=0, keepdims=True)[None]


def _stats_stash_kernel(p_ref, w_ref, y_ref, sum_ref, sq_ref):
    @pl.when(pl.program_id(1) == 0)
    def _():
        sum_ref[...] = jnp.zeros_like(sum_ref)
        sq_ref[...] = jnp.zeros_like(sq_ref)

    y = jnp.dot(p_ref[...], w_ref[...], preferred_element_type=jnp.float32)
    y_ref[...] = y.astype(y_ref.dtype)                 # stash f32 y for pass 2
    sum_ref[...] += jnp.sum(y, axis=0, keepdims=True)[None]
    sq_ref[...] += jnp.sum(y * y, axis=0, keepdims=True)[None]


# ---------- Pass 2: fused BatchNorm scale/shift (act = nn.Identity) --------------------
def _apply_recompute_kernel(p_ref, w_ref, scale_ref, shift_ref, o_ref):
    y = jnp.dot(p_ref[...], w_ref[...], preferred_element_type=jnp.float32)
    o_ref[...] = (y * scale_ref[...] + shift_ref[...]).astype(o_ref.dtype)


def _apply_stash_kernel(y_ref, scale_ref, shift_ref, o_ref):
    o_ref[...] = (y_ref[...] * scale_ref[...] + shift_ref[...]).astype(o_ref.dtype)


def conv_norm_layer(x, weight, gamma, beta, *, stride, padding, eps=1e-5,
                    matmul_dtype=jnp.bfloat16, stash_y=None, tile_m=4096,
                    out_format="NCHW"):
    """Forward of ConvNormLayer (norm='bn', act=None, bias=False).

    x: (N, C_in, H, W), weight: (C_out, C_in, kh, kw), gamma/beta: (C_out,)
    matmul_dtype: MXU operand dtype (bf16 default); stats/normalization stay f32.
    stash_y: None = auto traffic-based choice between recompute / y round-trip pass 2.
    Returns (N, C_out, OH, OW) for out_format="NCHW" (module-faithful) or NHWC.
    """
    N, C_in, H, W = x.shape
    C_out, _, kh, kw = weight.shape
    s, p = stride, padding
    OH = (H + 2 * p - kh) // s + 1
    OW = (W + 2 * p - kw) // s + 1
    M = N * OH * OW
    K = C_in * kh * kw

    mm_dtype = jnp.dtype(x.dtype if matmul_dtype is None else matmul_dtype)
    out_dtype = jnp.dtype(x.dtype)
    mm_bytes, out_bytes = mm_dtype.itemsize, out_dtype.itemsize

    # Pass 2 either re-reads patches (K*mm_bytes per output row) or round-trips the f32
    # conv output y (2*C_out*4 bytes per row). Pick the cheaper HBM path per layer shape.
    if stash_y is None:
        stash_y = K * mm_bytes > 2 * C_out * 4

    TM = _pick_tile_m(M, K, C_out, mm_bytes, out_bytes, stash_y, tile_m)
    Mp = _round_up(M, 2 * TM)          # even tile count so pass 1 splits across 2 cores
    n_tiles = Mp // TM
    n_half = n_tiles // 2

    # ---- glue: im2col built directly in NHWC order (data movement only) ----
    # TODO(synk): fold im2col into the kernel (per-tap shifted index_map over padded NHWC
    # input with a kh*kw reduction axis) to remove the kh*kw-inflated patches array.
    x_nhwc = jnp.transpose(x, (0, 2, 3, 1))                       # (N, H, W, C_in)
    xp = jnp.pad(x_nhwc, ((0, 0), (p, p), (p, p), (0, 0)))
    taps = [xp[:, i:i + (OH - 1) * s + 1:s, j:j + (OW - 1) * s + 1:s, :]
            for i in range(kh) for j in range(kw)]
    patches = jnp.concatenate(taps, axis=-1).reshape(M, K)        # feature order (kh,kw,cin)
    # Zero rows contribute 0 to sum/sumsq; stats divide by the TRUE M, so they stay exact.
    patches = jnp.pad(patches, ((0, Mp - M), (0, 0))).astype(mm_dtype)
    w_mat = jnp.transpose(weight, (2, 3, 1, 0)).reshape(K, C_out).astype(mm_dtype)

    params_p1 = pltpu.CompilerParams(dimension_semantics=("parallel", "arbitrary"),
                                     vmem_limit_bytes=_VMEM_LIMIT)
    params_p2 = pltpu.CompilerParams(dimension_semantics=("parallel",),
                                     vmem_limit_bytes=_VMEM_LIMIT)

    row_map_p1 = lambda c, i: (c * n_half + i, 0)
    stat_spec = pl.BlockSpec((1, 1, C_out), lambda c, i: (c, 0, 0))
    stat_shape = jax.ShapeDtypeStruct((2, 1, C_out), jnp.float32)
    p_spec_p1 = pl.BlockSpec((TM, K), row_map_p1)
    w_spec_p1 = pl.BlockSpec((K, C_out), lambda c, i: (0, 0))

    # ---- Pass 1: per-channel sum and sum-of-squares (2 cores x reduction axis) ----
    if stash_y:
        y_stash, ch_sum, ch_sq = pl.pallas_call(
            _stats_stash_kernel,
            out_shape=(jax.ShapeDtypeStruct((Mp, C_out), jnp.float32),
                       stat_shape, stat_shape),
            grid=(2, n_half),
            in_specs=[p_spec_p1, w_spec_p1],
            out_specs=(pl.BlockSpec((TM, C_out), row_map_p1), stat_spec, stat_spec),
            compiler_params=params_p1,
        )(patches, w_mat)
    else:
        ch_sum, ch_sq = pl.pallas_call(
            _stats_kernel,
            out_shape=(stat_shape, stat_shape),
            grid=(2, n_half),
            in_specs=[p_spec_p1, w_spec_p1],
            out_specs=(stat_spec, stat_spec),
            compiler_params=params_p1,
        )(patches, w_mat)

    # ---- BN batch statistics (f32, biased variance, true row count M) ----
    ch_sum = jnp.sum(ch_sum, axis=(0, 1))             # combine the two per-core partials
    ch_sq = jnp.sum(ch_sq, axis=(0, 1))
    mean = ch_sum / M
    var = jnp.maximum(ch_sq / M - mean * mean, 0.0)
    # TODO(synk): E[y^2]-mean^2 in f32 can cancel for very large M / large means; switch
    # to per-tile partial stats reduced in the wrapper if that regime matters.
    inv = jax.lax.rsqrt(var + eps)
    scale_v = gamma.astype(jnp.float32) * inv
    shift_v = beta.astype(jnp.float32) - mean * scale_v
    scale = scale_v.reshape(1, C_out)
    shift = shift_v.reshape(1, C_out)

    sc_spec = pl.BlockSpec((1, C_out), lambda i: (0, 0))
    o_spec = pl.BlockSpec((TM, C_out), lambda i: (i, 0))
    o_shape = jax.ShapeDtypeStruct((Mp, C_out), out_dtype)

    # ---- Pass 2: fused normalize, written with unpadded C_out lanes ----
    if stash_y:
        out = pl.pallas_call(
            _apply_stash_kernel,
            out_shape=o_shape, grid=(n_tiles,),
            in_specs=[pl.BlockSpec((TM, C_out), lambda i: (i, 0)), sc_spec, sc_spec],
            out_specs=o_spec, compiler_params=params_p2,
        )(y_stash, scale, shift)
    else:
        out = pl.pallas_call(
            _apply_recompute_kernel,
            out_shape=o_shape, grid=(n_tiles,),
            in_specs=[pl.BlockSpec((TM, K), lambda i: (i, 0)),
                      pl.BlockSpec((K, C_out), lambda i: (0, 0)),
                      sc_spec, sc_spec],
            out_specs=o_spec, compiler_params=params_p2,
        )(patches, w_mat, scale, shift)

    out = out[:M].reshape(N, OH, OW, C_out)
    if out_format == "NHWC":
        return out
    # TODO(synk): writing NCHW directly from pass 2 (per-image transposed store) would
    # remove this XLA transpose; kept for module-faithful NCHW output.
    return jnp.transpose(out, (0, 3, 1, 2))
    # TODO(synk): BatchNorm running_mean/running_var buffer updates (training-mode side
    # effect, unbiased var; does not affect the returned tensor) are not produced.


if __name__ == "__main__":
    # ConvNormLayer(ch_in=4, ch_out=8, kernel_size=3, stride=2) -> padding = 1
    N, C_in, H, W = 2, 4, 16, 16
    C_out, ksize, stride = 8, 3, 2
    padding = (ksize - 1) // 2

    key = jax.random.PRNGKey(0)
    kx, kw_ = jax.random.split(key)
    x = jax.random.normal(kx, (N, C_in, H, W), dtype=jnp.float32)
    weight = 0.1 * jax.random.normal(kw_, (C_out, C_in, ksize, ksize), dtype=jnp.float32)
    gamma = jnp.ones((C_out,), dtype=jnp.float32)    # BatchNorm2d default init
    beta = jnp.zeros((C_out,), dtype=jnp.float32)

    def bn_ref(y):
        mu = y.mean(axis=(0, 2, 3), keepdims=True)
        var = ((y - mu) ** 2).mean(axis=(0, 2, 3), keepdims=True)
        return (y - mu) / jnp.sqrt(var + 1e-5) * gamma.reshape(1, -1, 1, 1) \
            + beta.reshape(1, -1, 1, 1)

    # ---- exact f32 MXU path (auto-dispatches to the stash-y variant at this shape) ----
    out_f32 = conv_norm_layer(x, weight, gamma, beta, stride=stride, padding=padding,
                              matmul_dtype=jnp.float32)
    out_f32 = jax.block_until_ready(out_f32)
    y_f32 = jax.lax.conv_general_dilated(
        x, weight, (stride, stride), [(padding, padding), (padding, padding)],
        dimension_numbers=("NCHW", "OIHW", "NCHW"))
    ref_f32 = bn_ref(y_f32)
    assert out_f32.shape == ref_f32.shape, (out_f32.shape, ref_f32.shape)
    err_f32 = float(jnp.max(jnp.abs(out_f32 - ref_f32)))
    assert jnp.allclose(out_f32, ref_f32, atol=1e-4, rtol=1e-4), err_f32

    # ---- default bf16 MXU path, forced onto the recompute variant ----
    out_bf16 = conv_norm_layer(x, weight, gamma, beta, stride=stride, padding=padding,
                               stash_y=False)
    out_bf16 = jax.block_until_ready(out_bf16)
    y_bf16 = jax.lax.conv_general_dilated(
        x.astype(jnp.bfloat16), weight.astype(jnp.bfloat16), (stride, stride),
        [(padding, padding), (padding, padding)],
        dimension_numbers=("NCHW", "OIHW", "NCHW"),
        preferred_element_type=jnp.float32)
    ref_bf16 = bn_ref(y_bf16)
    err_bf16 = float(jnp.max(jnp.abs(out_bf16 - ref_bf16)))
    assert jnp.allclose(out_bf16, ref_bf16, atol=1e-2, rtol=1e-2), err_bf16

    print("KERNEL_OK")
</pallas_src>

<mosaic_0001>
module attributes {stable_mosaic.version = 11 : i64} {
  func.func @_stats_stash_kernel(%arg0: i32, %arg1: i32, %arg2: memref<128x36xf32, #tpu.memory_space<vmem>>, %arg3: memref<36x8xf32, #tpu.memory_space<vmem>>, %arg4: memref<128x8xf32, #tpu.memory_space<vmem>>, %arg5: memref<1x1x8xf32, #tpu.memory_space<vmem>>, %arg6: memref<1x1x8xf32, #tpu.memory_space<vmem>>) attributes {dimension_semantics = [#tpu.dimension_semantics<parallel>, #tpu.dimension_semantics<arbitrary>], iteration_bounds = array<i64: 2, 1>, scalar_prefetch = 0 : i64, scratch_operands = 0 : i64, tpu.core_type = #tpu.core_type<tc>, window_params = [{transform_indices = @transform_0, window_bounds = array<i64: 128, 36>}, {pipeline_mode = #tpu.pipeline_mode<synchronous>, transform_indices = @transform_1, window_bounds = array<i64: 36, 8>}, {transform_indices = @transform_2, window_bounds = array<i64: 128, 8>}, {transform_indices = @transform_3, window_bounds = array<i64: 1, 1, 8>}, {transform_indices = @transform_4, window_bounds = array<i64: 1, 1, 8>}]} {
    %c0_i32 = arith.constant 0 : i32
    %0 = arith.cmpi eq, %arg1, %c0_i32 : i32
    %1 = arith.extui %0 : i1 to i32
    %c0_i32_0 = arith.constant 0 : i32
    %2 = arith.cmpi ne, %1, %c0_i32_0 : i32
    scf.if %2 {
      %cst_20 = arith.constant 0.000000e+00 : f32
      %20 = vector.broadcast %cst_20 : f32 to vector<1x1x8xf32>
      %c0_21 = arith.constant 0 : index
      %c0_22 = arith.constant 0 : index
      %c0_23 = arith.constant 0 : index
      %21 = vector.load %arg5[%c0_21, %c0_22, %c0_23] : memref<1x1x8xf32, #tpu.memory_space<vmem>>, vector<1x1x8xf32>
      tpu.vector_store %arg5[%c0_21, %c0_22, %c0_23], %20 {strides = array<i32>} : memref<1x1x8xf32, #tpu.memory_space<vmem>>, vector<1x1x8xf32>,
      %cst_24 = arith.constant 0.000000e+00 : f32
      %22 = vector.broadcast %cst_24 : f32 to vector<1x1x8xf32>
      %c0_25 = arith.constant 0 : index
      %c0_26 = arith.constant 0 : index
      %c0_27 = arith.constant 0 : index
      %23 = vector.load %arg6[%c0_25, %c0_26, %c0_27] : memref<1x1x8xf32, #tpu.memory_space<vmem>>, vector<1x1x8xf32>
      tpu.vector_store %arg6[%c0_25, %c0_26, %c0_27], %22 {strides = array<i32>} : memref<1x1x8xf32, #tpu.memory_space<vmem>>, vector<1x1x8xf32>,
    } else {
    }
    %c0 = arith.constant 0 : index
    %c0_1 = arith.constant 0 : index
    %3 = vector.load %arg2[%c0, %c0_1] : memref<128x36xf32, #tpu.memory_space<vmem>>, vector<128x36xf32>
    %c0_2 = arith.constant 0 : index
    %c0_3 = arith.constant 0 : index
    %4 = vector.load %arg3[%c0_2, %c0_3] : memref<36x8xf32, #tpu.memory_space<vmem>>, vector<36x8xf32>
    %cst = arith.constant dense<0.000000e+00> : vector<128x8xf32>
    %5 = tpu.matmul %3, %4, %cst {dimension_numbers = #tpu.dot_dimension_numbers<[1], [0], [0], [1], [0, 0, 1, 1], [], []>} : vector<128x36xf32>, vector<36x8xf32>, vector<128x8xf32> -> vector<128x8xf32>
    %c0_4 = arith.constant 0 : index
    %c0_5 = arith.constant 0 : index
    %6 = vector.load %arg4[%c0_4, %c0_5] : memref<128x8xf32, #tpu.memory_space<vmem>>, vector<128x8xf32>
    tpu.vector_store %arg4[%c0_4, %c0_5], %5 {strides = array<i32>} : memref<128x8xf32, #tpu.memory_space<vmem>>, vector<128x8xf32>,
    %c0_6 = arith.constant 0 : index
    %c0_7 = arith.constant 0 : index
    %c0_8 = arith.constant 0 : index
    %7 = vector.load %arg5[%c0_6, %c0_7, %c0_8] : memref<1x1x8xf32, #tpu.memory_space<vmem>>, vector<1x1x8xf32>
    %cst_9 = arith.constant dense<0.000000e+00> : vector<8xf32>
    %8 = vector.multi_reduction <add>, %5, %cst_9 [0] : vector<128x8xf32> to vector<8xf32>
    %9 = vector.shape_cast %8 : vector<8xf32> to vector<1x8xf32>
    %10 = vector.shape_cast %9 : vector<1x8xf32> to vector<1x1x8xf32>
    %11 = arith.addf %7, %10 : vector<1x1x8xf32>
    %c0_10 = arith.constant 0 : index
    %c0_11 = arith.constant 0 : index
    %c0_12 = arith.constant 0 : index
    %12 = vector.load %arg5[%c0_10, %c0_11, %c0_12] : memref<1x1x8xf32, #tpu.memory_space<vmem>>, vector<1x1x8xf32>
    tpu.vector_store %arg5[%c0_10, %c0_11, %c0_12], %11 {strides = array<i32>} : memref<1x1x8xf32, #tpu.memory_space<vmem>>, vector<1x1x8xf32>,
    %c0_13 = arith.constant 0 : index
    %c0_14 = arith.constant 0 : index
    %c0_15 = arith.constant 0 : index
    %13 = vector.load %arg6[%c0_13, %c0_14, %c0_15] : memref<1x1x8xf32, #tpu.memory_space<vmem>>, vector<1x1x8xf32>
    %14 = arith.mulf %5, %5 : vector<128x8xf32>
    %cst_16 = arith.constant dense<0.000000e+00> : vector<8xf32>
    %15 = vector.multi_reduction <add>, %14, %cst_16 [0] : vector<128x8xf32> to vector<8xf32>
    %16 = vector.shape_cast %15 : vector<8xf32> to vector<1x8xf32>
    %17 = vector.shape_cast %16 : vector<1x8xf32> to vector<1x1x8xf32>
    %18 = arith.addf %13, %17 : vector<1x1x8xf32>
    %c0_17 = arith.constant 0 : index
    %c0_18 = arith.constant 0 : index
    %c0_19 = arith.constant 0 : index
    %19 = vector.load %arg6[%c0_17, %c0_18, %c0_19] : memref<1x1x8xf32, #tpu.memory_space<vmem>>, vector<1x1x8xf32>
    tpu.vector_store %arg6[%c0_17, %c0_18, %c0_19], %18 {strides = array<i32>} : memref<1x1x8xf32, #tpu.memory_space<vmem>>, vector<1x1x8xf32>,
    return
  }
  func.func @transform_0(%arg0: i32, %arg1: i32) -> (i32, i32) {
    %c1_i32 = arith.constant 1 : i32
    %0 = arith.muli %arg0, %c1_i32 : i32
    %1 = arith.addi %0, %arg1 : i32
    %c0_i32 = arith.constant 0 : i32
    %c0_i32_0 = arith.constant 0 : i32
    return %1, %c0_i32 : i32, i32
  }
  func.func @transform_1(%arg0: i32, %arg1: i32) -> (i32, i32) {
    %c0_i32 = arith.constant 0 : i32
    %c0_i32_0 = arith.constant 0 : i32
    %c0_i32_1 = arith.constant 0 : i32
    return %c0_i32, %c0_i32_0 : i32, i32
  }
  func.func @transform_2(%arg0: i32, %arg1: i32) -> (i32, i32) {
    %c1_i32 = arith.constant 1 : i32
    %0 = arith.muli %arg0, %c1_i32 : i32
    %1 = arith.addi %0, %arg1 : i32
    %c0_i32 = arith.constant 0 : i32
    %c0_i32_0 = arith.constant 0 : i32
    return %1, %c0_i32 : i32, i32
  }
  func.func @transform_3(%arg0: i32, %arg1: i32) -> (i32, i32, i32) {
    %c0_i32 = arith.constant 0 : i32
    %c0_i32_0 = arith.constant 0 : i32
    %c0_i32_1 = arith.constant 0 : i32
    return %arg0, %c0_i32, %c0_i32_0 : i32, i32, i32
  }
  func.func @transform_4(%arg0: i32, %arg1: i32) -> (i32, i32, i32) {
    %c0_i32 = arith.constant 0 : i32
    %c0_i32_0 = arith.constant 0 : i32
    %c0_i32_1 = arith.constant 0 : i32
    return %arg0, %c0_i32, %c0_i32_0 : i32, i32, i32
  }
}

</mosaic_0001>

<bundles_post_ra>
// kernel: tpu_custom_call.1
= control target key start
LH: loop header
LB: loop body
LE: loop exit
PB: predicated region body
PF: predicated region fallthrough
CT: control target
= control target key end

     0   :  { %10 = vsyncpa [#allocation3], 0  ;;  %s1332_s0 = inlined_call_operand.vmem [shape: f32[256,36], index: 0, kind: input, shape index: {}]   ;;  %s1333_s1 = inlined_call_operand.vmem [shape: f32[36,8], index: 1, kind: input, shape index: {}]   ;;  %s1334_s2 = inlined_call_operand.vmem [shape: f32[256,8], index: 2, kind: output, shape index: {0}]   ;;  %s1335_s3 = inlined_call_operand.hbm [shape: f32[2,1,8], index: 3, kind: output, shape index: {1}]   ;;  %s1336_s4 = inlined_call_operand.hbm [shape: f32[2,1,8], index: 4, kind: output, shape index: {2}]  }
   0x1   :  { %12 = vsyncpa [#allocation3 + $0x1], 0 }
   0x2   :  { %13 = vsyncpa [#allocation5], 0 }
   0x3   :  { %15 = vsyncpa [#allocation5 + $0x1], 0  ;;  %s1034_s15 = smov 0   ;;  %s1036_s16 = smov 0  }
   0x4   :  { %s1038_s17 = smov 0   ;;  %s1040_s18 = smov 0  }
   0x5   :  { %s1042_s19 = smov 0   ;;  %s1044_s20 = smov 0  }
   0x6 LB: > { %s742_s21 = sadd.s32 4294967295, %s1004_s20   ;;  %s743_s22 = sadd.s32 4294967294, %s1004_s20   ;;  %s1004_s20 = sphi %s1044_s20, %s21_s20   ;;  %s1000_s19 = sphi %s1042_s19, %s1343_s19   ;;  %s996_s18 = sphi %s1040_s18, %s1342_s18   ;;  %s992_s17 = sphi %s1038_s17, %s1341_s17   ;;  %s988_s16 = sphi %s1036_s16, %s1340_s16   ;;  %s984_s15 = sphi %s1034_s15, %s1339_s15  }
   0x7   : > { %s33_s23 = sadd.s32 1, %s1000_s19  ;;  %s117_s24 = sadd.s32 1, %s992_s17 }
   0x8   : > { %p35_p0 = scmp.ge.s32.totalorder %s33_s23, 2  ;;  %p127_p1 = scmp.ne.s32.totalorder %s992_s17, %s988_s16 }
   0x9   : > { %p128_p2 = scmp.eq.s32.totalorder %s742_s21, 1  ;;  %p133_p3 = scmp.ne.s32.totalorder %s988_s16, %s984_s15 }
   0xa   : > { %s1345_s23 = smov (%p35_p0, %s33_s23), 0  ;;  %p134_p5 = scmp.eq.s32.totalorder %s743_s22, 1 }
   0xb   : > { %p1072_p4 = por %p128_p2, %p127_p1  ;;  %s114_s26 = ssub.s32 %s1000_s19, %s1345_s23 }
   0xc   : > { %p746_p6 = scmp.ge.s32.totalorder %s1004_s20, 1  ;;  %p115_p7 = scmp.eq.s32.totalorder %s114_s26, 0 }
   0xd   : > { %p1079_p8 = por %p134_p5, %p133_p3  ;;  %p192_p9 = scmp.lt.s32.totalorder %s1004_s20, 3 }
   0xe   : > { %s1085_s28 = scalar_select %p115_p7, %s992_s17, %s117_s24  }
   0xf   : > { %p193_p10 = pnand %p746_p6, %p192_p9 }
  0x10   : > { %s1093_s7 = sshll.u32 (!%p193_p10), %s996_s18, 4  ;;  %s1149_s26 = sand.u32 (!%p193_p10), 1, %s988_s16  }
  0x11   : > { %196 = sbr.rel (%p193_p10) target bundleno = 310 (0x136), region = 28  ;;  %p230_p11 = scmp.lt.s32.totalorder (!%p193_p10), %s1093_s7, 31 }
  0x12   : > { %s1152_s29 = scalar_lea.vmem (!%p193_p10), [#allocation2], %s1149_s26  ;;  %s1157_s30 = scalar_lea.vmem (!%p193_p10), [#allocation4], %s1149_s26 }
  0x13   : > { %s612_s9 = sshll.u32 (!%p193_p10), %s1152_s29, 4  ;;  %s1262_s21 = scalar_lea.hbm (!%p193_p10), %s1336_s4, %s1093_s7  ;;  %s1254_s9 = int_to_ptr.vmem [resolvable:$true] %s612_s9 }
  0x14   : > { %s591_s22 = scalar_lea.sflag (!%p193_p10), [#allocation3], %s1149_s26  ;;  %s1007_s5 = smov (!%p193_p10), [#allocation2]  }
  0x15   : > { %s902_s6 = sshll.u32 (!%p193_p10), %s1007_s5, 4  ;;  %s903_s6 = int_to_ptr.vmem [resolvable:$false] %s902_s6 }
  0x16   : > { %v271_v0 = vld [vmem:[%s1333_s1 + $0x20] sm:$0xf]  ;;  %vm321_vm0 = vcmask 1043456   ;;  %v270_v1 = vld [vmem:[%s1333_s1 + $0x18] sm:$0xff]  ;;  %v269_v2 = vld [vmem:[%s1333_s1 + $0x10] sm:$0xff]  ;;  %s1100_s10 = scalar_select %p230_p11, %s1093_s7, 31 }
  0x17   : > { %793 = vmatprep.subr.msk.mxu0 %vm321_vm0, %v271_v0  ;;  %827 = vmatprep.subr.msk.mxu1 %vm321_vm0, %v271_v0  ;;  %v268_v3 = vld [vmem:[%s1333_s1 + $0x8] sm:$0xff]  ;;  %vm272_vm1 = vcmask 293888   ;;  %v267_v4 = vld [vmem:[%s1333_s1] sm:$0xff]  ;;  %vm248_vm2 = vcmask 57344   ;;  %v1006_v21 = vmov 0.0   ;;  %vm470_vm3 = vcmask 64512   ;;  %p905_p1 = scmp.lt.s32.totalorder %s1254_s9, %s903_s6 }
  0x18   : > { %794 = vmatpush3.msk.msra.mxu0 %vm321_vm0, %v271_v0  ;;  %832 = vmatpush3.msk.msra.mxu1 %vm321_vm0, %v271_v0  ;;  %s748_s13 = sshll.u32 %s1100_s10, 3  ;;  %249 = vst.msk [vmem:[%s1152_s29] sm:$0x1] %vm248_vm2, %v1006_v21  ;;  %250 = vst.msk [vmem:[%s1157_s30] sm:$0x1] %vm248_vm2, %v1006_v21  ;;  %s625_s10 = sshll.u32 %s1157_s30, 4  ;;  %s1264_s10 = int_to_ptr.vmem [resolvable:$true] %s625_s10 }
  0x19   : > { %795 = vmatprep.subr.mxu0 %v270_v1  ;;  %828 = vmatprep.subr.mxu1 %v270_v1  ;;  %s1114_s24 = scalar_lea.vmem %s1332_s0, %s748_s13  ;;  %s1166_s8 = scalar_lea.vmem %s1334_s2, %s748_s13 }
  0x1a   : > { %796 = vmatpush3.msra.mxu0 %v270_v1  ;;  %833 = vmatpush3.msra.mxu1 %v270_v1  ;;  %v251_v5 = vld [vmem:[%s1114_s24] sm:$0xff]  ;;  %v252_v6 = vld [vmem:[%s1114_s24 + $0x8] sm:$0xff]  ;;  %v253_v7 = vld [vmem:[%s1114_s24 + $0x10] sm:$0xff]  ;;  %s1252_s13 = scalar_lea.hbm %s1335_s3, %s1093_s7 }
  0x1b   : > { %797 = vmatprep.subr.mxu0 %v269_v2  ;;  %829 = vmatprep.subr.mxu1 %v269_v2  ;;  %v259_v8 = vld [vmem:[%s1114_s24 + $0x40] sm:$0xff]  ;;  %v260_v9 = vld [vmem:[%s1114_s24 + $0x48] sm:$0xff]  ;;  %v261_v10 = vld [vmem:[%s1114_s24 + $0x50] sm:$0xff] }
  0x1c   : > { %798 = vmatpush3.msra.mxu0 %v269_v2  ;;  %834 = vmatpush3.msra.mxu1 %v269_v2  ;;  %v254_v11 = vld [vmem:[%s1114_s24 + $0x18] sm:$0xff]  ;;  %v255_v12 = vld [vmem:[%s1114_s24 + $0x20] sm:$0xff]  ;;  %v256_v15 = vld [vmem:[%s1114_s24 + $0x28] sm:$0xff] }
  0x1d   : > { %799 = vmatprep.subr.mxu0 %v268_v3  ;;  %830 = vmatprep.subr.mxu1 %v268_v3  ;;  %v262_v13 = vld [vmem:[%s1114_s24 + $0x58] sm:$0xff]  ;;  %v263_v14 = vld [vmem:[%s1114_s24 + $0x60] sm:$0xff]  ;;  %v257_v16 = vld [vmem:[%s1114_s24 + $0x30] sm:$0xff] }
  0x1e   : > { %800 = vmatpush3.msra.mxu0 %v268_v3  ;;  %803 = vmatprep.mubr.msk.f32.mxu0 %vm272_vm1, %v251_v5  ;;  %v264_v17 = vld [vmem:[%s1114_s24 + $0x68] sm:$0xff]  ;;  %v265_v18 = vld [vmem:[%s1114_s24 + $0x70] sm:$0xff]  ;;  %v258_v19 = vld [vmem:[%s1114_s24 + $0x38] sm:$0xff] }
  0x1f   : > { %801 = vmatprep.subr.mxu0 %v267_v4  ;;  %835 = vmatpush3.msra.mxu1 %v268_v3  ;;  %v266_v20 = vld [vmem:[%s1114_s24 + $0x78] sm:$0xff]  ;;  %s898_s24 = scalar_lea.vmem %s1254_s9, 16 }
  0x20   : > { %802 = vmatpush3.msra.mxu0 %v267_v4  ;;  %831 = vmatprep.subr.mxu1 %v267_v4  ;;  %p899_p12 = scmp.ne.s32.totalorder %s1254_s9, %s898_s24 }
  0x21   : > { %804 = vmatmul.mubr.msk.f32.vlgmr.msra.gmra.mxu0 %vm272_vm1, %v252_v6  ;;  %836 = vmatpush3.msra.mxu1 %v267_v4 }
  0x22   : > { %806 = vmatprep.mubr.msk.f32.mxu0 %vm272_vm1, %v253_v7  ;;  %815 = vmatprep.mubr.msk.f32.mxu1 %vm272_vm1, %v259_v8  ;;  %p900_p13 = pnand %p899_p12, %p1072_p4 }
  0x23   : > { %816 = vmatmul.mubr.msk.f32.vlgmr.msra.gmra.mxu1 %vm272_vm1, %v260_v9 }
  0x24   : > { %818 = vmatprep.mubr.msk.f32.mxu1 %vm272_vm1, %v261_v10  ;;  %p901_p0 = pneg %p900_p13 }
  0x25   : > { %807 = vmatmul.mubr.msk.f32.gmra.mxu0 %vm272_vm1, %v254_v11 }
  0x26   : > { %809 = vmatprep.mubr.msk.f32.mxu0 %vm272_vm1, %v255_v12 }
  0x27   : > { %819 = vmatmul.mubr.msk.f32.gmra.mxu1 %vm272_vm1, %v262_v13 }
  0x28   : > { %821 = vmatprep.mubr.msk.f32.mxu1 %vm272_vm1, %v263_v14 }
  0x29   : > { %810 = vmatmul.mubr.msk.f32.gmra.mxu0 %vm272_vm1, %v256_v15 }
  0x2a   : > { %812 = vmatprep.mubr.msk.f32.mxu0 %vm272_vm1, %v257_v16 }
  0x2b   : > { %822 = vmatmul.mubr.msk.f32.gmra.mxu1 %vm272_vm1, %v264_v17 }
  0x2c   : > { %824 = vmatprep.mubr.msk.f32.mxu1 %vm272_vm1, %v265_v18 }
  0x2d   : > { %813 = vmatmul.mubr.msk.f32.gmra.mxu0 %vm272_vm1, %v258_v19 }
  0x2f   : > { %825 = vmatmul.mubr.msk.f32.gmra.mxu1 %vm272_vm1, %v266_v20 }
  0xe1   : > { %v805_v22 = vpop.f32.mrf.mxu0 }
  0xe2   : > { %472 = vst.msk [vmem:[%s1166_s8 + $0x8] sm:$0xff] %vm470_vm3, %v805_v22  ;;  %v530_v25 = vmul.f32 %v805_v22, %v805_v22  ;;  %v489_v30 = vsel %vm470_vm3, %v805_v22, 0.0 }
  0xe3   : > { %v391_v23 = vpop.f32.mrf.mxu0  ;;  %v1170_v24 = vpop.f32.mrf.mxu1 }
  0xe4   : > { %471 = vst.msk [vmem:[%s1166_s8] sm:$0xff] %vm470_vm3, %v391_v23  ;;  %v488_v26 = vsel %vm470_vm3, %v391_v23, 0.0  ;;  %v529_v27 = vmul.f32 %v391_v23, %v391_v23  ;;  %480 = vst.msk [vmem:[%s1166_s8 + $0x48] sm:$0xff] %vm470_vm3, %v1170_v24  ;;  %v546_v35 = vsel %vm470_vm3, %v530_v25, 0.0  ;;  %v538_v12 = vmul.f32 %v1170_v24, %v1170_v24 }
  0xe5   : > { %v808_v28 = vpop.f32.mrf.mxu0  ;;  %v431_v29 = vpop.f32.mrf.mxu1  ;;  %v490_v32 = vadd.f32 %v489_v30, %v488_v26  ;;  %v505_v16 = vsel %vm470_vm3, %v1170_v24, 0.0 }
  0xe6   : > { %v545_v31 = vsel %vm470_vm3, %v529_v27, 0.0  ;;  %474 = vst.msk [vmem:[%s1166_s8 + $0x18] sm:$0xff] %vm470_vm3, %v808_v28  ;;  %479 = vst.msk [vmem:[%s1166_s8 + $0x40] sm:$0xff] %vm470_vm3, %v431_v29  ;;  %v532_v36 = vmul.f32 %v808_v28, %v808_v28  ;;  %v493_v43 = vsel %vm470_vm3, %v808_v28, 0.0  ;;  %v537_v8 = vmul.f32 %v431_v29, %v431_v29 }
  0xe7   : > { %v401_v33 = vpop.f32.mrf.mxu0  ;;  %v1184_v34 = vpop.f32.mrf.mxu1  ;;  %v547_v39 = vadd.f32 %v546_v35, %v545_v31  ;;  %v503_v13 = vsel %vm470_vm3, %v431_v29, 0.0  ;;  %v562_v21 = vsel %vm470_vm3, %v538_v12, 0.0 }
  0xe8   : > { %473 = vst.msk [vmem:[%s1166_s8 + $0x10] sm:$0xff] %vm470_vm3, %v401_v33  ;;  %v491_v37 = vsel %vm470_vm3, %v401_v33, 0.0  ;;  %v531_v38 = vmul.f32 %v401_v33, %v401_v33  ;;  %482 = vst.msk [vmem:[%s1166_s8 + $0x58] sm:$0xff] %vm470_vm3, %v1184_v34  ;;  %v550_v49 = vsel %vm470_vm3, %v532_v36, 0.0  ;;  %v560_v17 = vsel %vm470_vm3, %v537_v8, 0.0 }
  0xe9   : > { %v492_v40 = vadd.f32 %v491_v37, %v490_v32  ;;  %v811_v41 = vpop.f32.mrf.mxu0  ;;  %v441_v42 = vpop.f32.mrf.mxu1  ;;  %v540_v22 = vmul.f32 %v1184_v34, %v1184_v34  ;;  %v509_v27 = vsel %vm470_vm3, %v1184_v34, 0.0 }
  0xea   : > { %v548_v44 = vsel %vm470_vm3, %v531_v38, 0.0  ;;  %476 = vst.msk [vmem:[%s1166_s8 + $0x28] sm:$0xff] %vm470_vm3, %v811_v41  ;;  %481 = vst.msk [vmem:[%s1166_s8 + $0x50] sm:$0xff] %vm470_vm3, %v441_v42  ;;  %v534_v50 = vmul.f32 %v811_v41, %v811_v41  ;;  %v497_v57 = vsel %vm470_vm3, %v811_v41, 0.0  ;;  %v539_v18 = vmul.f32 %v441_v42, %v441_v42 }
  0xeb   : > { %v549_v45 = vadd.f32 %v548_v44, %v547_v39  ;;  %v411_v46 = vpop.f32.mrf.mxu0  ;;  %v494_v47 = vadd.f32 %v493_v43, %v492_v40  ;;  %v823_v48 = vpop.f32.mrf.mxu1  ;;  %v507_v23 = vsel %vm470_vm3, %v441_v42, 0.0  ;;  %v566_v31 = vsel %vm470_vm3, %v540_v22, 0.0 }
  0xec   : > { %475 = vst.msk [vmem:[%s1166_s8 + $0x20] sm:$0xff] %vm470_vm3, %v411_v46  ;;  %v495_v51 = vsel %vm470_vm3, %v411_v46, 0.0  ;;  %v533_v52 = vmul.f32 %v411_v46, %v411_v46  ;;  %484 = vst.msk [vmem:[%s1166_s8 + $0x68] sm:$0xff] %vm470_vm3, %v823_v48  ;;  %v554_v63 = vsel %vm470_vm3, %v534_v50, 0.0  ;;  %v564_v28 = vsel %vm470_vm3, %v539_v18, 0.0 }
  0xed   : > { %v496_v53 = vadd.f32 %v495_v51, %v494_v47  ;;  %v551_v54 = vadd.f32 %v550_v49, %v549_v45  ;;  %v814_v55 = vpop.f32.mrf.mxu0  ;;  %v451_v56 = vpop.f32.mrf.mxu1  ;;  %v542_v32 = vmul.f32 %v823_v48, %v823_v48  ;;  %v513_v37 = vsel %vm470_vm3, %v823_v48, 0.0 }
  0xee   : > { %v552_v58 = vsel %vm470_vm3, %v533_v52, 0.0  ;;  %478 = vst.msk [vmem:[%s1166_s8 + $0x38] sm:$0xff] %vm470_vm3, %v814_v55  ;;  %483 = vst.msk [vmem:[%s1166_s8 + $0x60] sm:$0xff] %vm470_vm3, %v451_v56  ;;  %v536_v0 = vmul.f32 %v814_v55, %v814_v55  ;;  %v501_v6 = vsel %vm470_vm3, %v814_v55, 0.0  ;;  %v541_v24 = vmul.f32 %v451_v56, %v451_v56 }
  0xef   : > { %v553_v59 = vadd.f32 %v552_v58, %v551_v54  ;;  %v421_v60 = vpop.f32.mrf.mxu0  ;;  %v498_v61 = vadd.f32 %v497_v57, %v496_v53  ;;  %v826_v62 = vpop.f32.mrf.mxu1  ;;  %v511_v33 = vsel %vm470_vm3, %v451_v56, 0.0  ;;  %v570_v34 = vsel %vm470_vm3, %v542_v32, 0.0 }
  0xf0   : > { %477 = vst.msk [vmem:[%s1166_s8 + $0x30] sm:$0xff] %vm470_vm3, %v421_v60  ;;  %v499_v1 = vsel %vm470_vm3, %v421_v60, 0.0  ;;  %v535_v2 = vmul.f32 %v421_v60, %v421_v60  ;;  %486 = vst.msk [vmem:[%s1166_s8 + $0x78] sm:$0xff] %vm470_vm3, %v826_v62  ;;  %v558_v11 = vsel %vm470_vm3, %v536_v0, 0.0  ;;  %v568_v38 = vsel %vm470_vm3, %v541_v24, 0.0 }
  0xf1   : > { %v500_v3 = vadd.f32 %v499_v1, %v498_v61  ;;  %v555_v4 = vadd.f32 %v554_v63, %v553_v59  ;;  %v461_v5 = vpop.f32.mrf.mxu1  ;;  %v544_v42 = vmul.f32 %v826_v62, %v826_v62  ;;  %v517_v46 = vsel %vm470_vm3, %v826_v62, 0.0  ;;  %v487_v61 = vld [vmem:[%s1152_s29] sm:$0x1] }
  0xf2   : > { %v556_v7 = vsel %vm470_vm3, %v535_v2, 0.0  ;;  %485 = vst.msk [vmem:[%s1166_s8 + $0x70] sm:$0xff] %vm470_vm3, %v461_v5  ;;  %v543_v39 = vmul.f32 %v461_v5, %v461_v5  ;;  %v515_v43 = vsel %vm470_vm3, %v461_v5, 0.0  ;;  %v528_v0 = vld [vmem:[%s1157_s30] sm:$0x1]  ;;  %s904_s8 = scalar_lea.vmem %s903_s6, 32 }
  0xf3   : > { %v502_v9 = vadd.f32 %v501_v6, %v500_v3  ;;  %v557_v10 = vadd.f32 %v556_v7, %v555_v4  ;;  %v574_v50 = vsel %vm470_vm3, %v544_v42, 0.0  ;;  %p906_p2 = scmp.lt.s32.totalorder %s904_s8, %s898_s24 }
  0xf4   : > { %v572_v47 = vsel %vm470_vm3, %v543_v39, 0.0 }
  0xf5   : > { %v559_v14 = vadd.f32 %v558_v11, %v557_v10  ;;  %v504_v15 = vadd.f32 %v503_v13, %v502_v9  ;;  %p907_p3 = por %p906_p2, %p905_p1 }
  0xf7   : > { %v561_v19 = vadd.f32 %v560_v17, %v559_v14  ;;  %v506_v20 = vadd.f32 %v505_v16, %v504_v15  ;;  %p908_p5 = pnand %p907_p3, %p901_p0 }
  0xf9   : > { %v508_v25 = vadd.f32 %v507_v23, %v506_v20  ;;  %v563_v26 = vadd.f32 %v562_v21, %v561_v19 }
  0xfb   : > { %v565_v29 = vadd.f32 %v564_v28, %v563_v26  ;;  %v510_v30 = vadd.f32 %v509_v27, %v508_v25 }
  0xfd   : > { %v512_v35 = vadd.f32 %v511_v33, %v510_v30  ;;  %v567_v36 = vadd.f32 %v566_v31, %v565_v29 }
  0xff   : > { %v569_v40 = vadd.f32 %v568_v38, %v567_v36  ;;  %v514_v41 = vadd.f32 %v513_v37, %v512_v35 }
 0x101   : > { %v516_v44 = vadd.f32 %v515_v43, %v514_v41  ;;  %v571_v45 = vadd.f32 %v570_v34, %v569_v40 }
 0x103   : > { %v518_v49 = vadd.f32 %v517_v46, %v516_v44  ;;  %v573_v48 = vadd.f32 %v572_v47, %v571_v45 }
 0x105   : > { %v519_v51 = vrot.slane %v518_v49, 4  ;;  %v575_v52 = vadd.f32 %v574_v50, %v573_v48 }
 0x107   : > { %v520_v53 = vadd.f32 %v519_v51, %v518_v49  ;;  %v576_v54 = vrot.slane %v575_v52, 4 }
 0x109   : > { %v521_v55 = vrot.slane %v520_v53, 2  ;;  %v577_v56 = vadd.f32 %v576_v54, %v575_v52 }
 0x10b   : > { %v522_v57 = vadd.f32 %v521_v55, %v520_v53  ;;  %v578_v58 = vrot.slane %v577_v56, 2 }
 0x10d   : > { %v523_v59 = vrot.slane %v522_v57, 1  ;;  %v579_v60 = vadd.f32 %v578_v58, %v577_v56 }
 0x10f   : > { %v524_v62 = vadd.f32 %v523_v59, %v522_v57  ;;  %v580_v63 = vrot.slane %v579_v60, 1 }
 0x111   : > { %v525_v1 = vadd.f32 %v524_v62, %v487_v61  ;;  %v581_v2 = vadd.f32 %v580_v63, %v579_v60 }
 0x113   : > { %527 = vst.msk [vmem:[%s1152_s29] sm:$0x1] %vm248_vm2, %v525_v1  ;;  %v582_v3 = vadd.f32 %v581_v2, %v528_v0 }
 0x114   : > { %911 = shalt.err (!%p908_p5)
}
 0x115   : > { %s912_s7 = scalar_lea.hbm %s1252_s13, 16  ;;  %s916_s12 = scalar_lea.hbm %s1335_s3, 32 }
 0x116   : > { %p913_p6 = scmp.ne.s32.totalorder %s1252_s13, %s912_s7  ;;  %p917_p10 = scmp.lt.s32.totalorder %s1252_s13, %s1335_s3 }
 0x117   : > { %p918_p11 = scmp.lt.s32.totalorder %s916_s12, %s912_s7 }
 0x118   : > { %p914_p7 = pnand %p913_p6, %p1072_p4 }
 0x119   : > { %p919_p12 = por %p918_p11, %p917_p10 }
 0x11a   : > { %p915_p9 = pneg %p914_p7 }
 0x11c   : > { %p920_p13 = pnand %p919_p12, %p915_p9 }
 0x11e   : > { %923 = shalt.err (!%p920_p13)
}
 0x11f   : > { %837 = dma.vmem_to_hbm [thread:$0]  (%p1072_p4), %s1254_s9, 16, %s1252_s13, %s591_s22   ;;  %583 = vst.msk [vmem:[%s1157_s30] sm:$0x1] %vm248_vm2, %v582_v3 }
 0x120   : > { %s595_s24 = scalar_lea.sflag [#allocation5], %s1149_s26  ;;  %s924_s5 = scalar_lea.vmem %s1264_s10, 16 }
 0x121   : > { %p925_p0 = scmp.ne.s32.totalorder %s1264_s10, %s924_s5  ;;  %s1008_s6 = smov [#allocation4]  }
 0x122   : > { %s928_s8 = sshll.u32 %s1008_s6, 4  ;;  %s929_s8 = int_to_ptr.vmem [resolvable:$false] %s928_s8 }
 0x123   : > { %p926_p1 = pnand %p925_p0, %p1072_p4  ;;  %s930_s7 = scalar_lea.vmem %s929_s8, 32 }
 0x124   : > { %p931_p3 = scmp.lt.s32.totalorder %s1264_s10, %s929_s8  ;;  %p932_p5 = scmp.lt.s32.totalorder %s930_s7, %s924_s5 }
 0x125   : > { %p927_p2 = pneg %p926_p1 }
 0x126   : > { %p933_p6 = por %p932_p5, %p931_p3 }
 0x128   : > { %p934_p7 = pnand %p933_p6, %p927_p2 }
 0x12a   : > { %937 = shalt.err (!%p934_p7)
}
 0x12b   : > { %s938_s30 = scalar_lea.hbm %s1262_s21, 16  ;;  %s942_s13 = scalar_lea.hbm %s1336_s4, 32 }
 0x12c   : > { %p939_p9 = scmp.ne.s32.totalorder %s1262_s21, %s938_s30  ;;  %p943_p12 = scmp.lt.s32.totalorder %s1262_s21, %s1336_s4 }
 0x12d   : > { %p944_p13 = scmp.lt.s32.totalorder %s942_s13, %s938_s30 }
 0x12e   : > { %p940_p10 = pnand %p939_p9, %p1072_p4 }
 0x12f   : > { %p945_p0 = por %p944_p13, %p943_p12 }
 0x130   : > { %p941_p11 = pneg %p940_p10 }
 0x132   : > { %p946_p1 = pnand %p945_p0, %p941_p11 }
 0x134   : > { %949 = shalt.err (!%p946_p1)
}
 0x135   : > { %838 = dma.vmem_to_hbm [thread:$0]  (%p1072_p4), %s1264_s10, 16, %s1262_s21, %s595_s24  }
 0x136 PF: > { %p848_p2 = scmp.ge.s32.totalorder %s1004_s20, 2  ;;  %s646_s11 = sand.u32 1, %s984_s15  }
 0x137   : > { %s647_s12 = scalar_lea.sflag [#allocation3], %s646_s11 }
 0x138   : > { %p842_p3 = pnand %p848_p2, %p1079_p8 }
 0x13a   : > { %p843_p5 = pneg %p842_p3 }
 0x13c   : > { %975 = dma.done.wait (%p843_p5), %s647_s12, 16  }
 0x13d   : > { %977 = vsyncadd (%p843_p5), %s647_s12, 4294967280  ;;  %s655_s14 = scalar_lea.sflag [#allocation5], %s646_s11 }
 0x13e   : > { %979 = dma.done.wait (%p843_p5), %s655_s14, 16  }
 0x13f   : > { %981 = vsyncadd (%p843_p5), %s655_s14, 4294967280  ;;  %s21_s20 = sadd.s32 1, %s1004_s20   ;;  %s1339_s15 = smov %s988_s16 }
 0x140   : > { %p18_p6 = scmp.ge.s32.totalorder %s21_s20, 4   ;;  %s1340_s16 = smov %s992_s17 }
 0x141   : > { %s1341_s17 = smov %s1085_s28  ;;  %s1342_s18 = smov %s1000_s19 }
 0x142   : > { %s1343_s19 = smov %s1345_s23  ;;  %20 = sbr.rel (!%p18_p6) target bundleno = 6 (0x6), region = 96 }
 0x147   :  { %659 = vsyncpa [#allocation3], 1 }
 0x148   :  { %661 = vsyncpa [#allocation3 + $0x1], 1 }
 0x149   :  { %662 = vsyncpa [#allocation5], 1 }
 0x14a   :  { %664 = vsyncpa [#allocation5 + $0x1], 1 }

</bundles_post_ra>
